<compile_context>
chip_gen: v5e
topology: v5e:2x2
jax: 0.10.0
libtpu: 0.0.40
codegen_flags: <defaults>
</compile_context>

<pallas_src>
import functools

import jax
import jax.numpy as jnp
from jax.experimental import pallas as pl
from jax.experimental.pallas import tpu as pltpu


def _round_up(x, m):
    return (x + m - 1) // m * m


def _physical_vmem_bytes():
    """Per-core VMEM capacity; conservative (v7x) fallback if the query fails."""
    try:
        info = pltpu.get_tpu_info()
        cap = int(getattr(info, "vmem_capacity_bytes", 0) or 0)
        if cap > 0:
            return cap
    except Exception:
        pass
    return 64 * 1024 * 1024


def _ce_kl_kernel(logits_ref, cent_ref, lab_ref, out_ref, *, batch, has_pad):
    """One batch tile: fused log-softmax stats feeding CE + KL partial sums."""
    i = pl.program_id(0)

    logits = logits_ref[...].astype(jnp.float32)            # (TM, C)
    logcent = jnp.log(cent_ref[...].astype(jnp.float32))    # (TM, C) centroids.log()
    labels = lab_ref[...]                                    # (TM, 1) int32
    tm, c = logits.shape

    # ---- shared row-wise softmax statistics ----
    row_max = jnp.max(logits, axis=1, keepdims=True)         # (TM, 1)
    shifted = logits - row_max                                # (TM, C)
    exp_s = jnp.exp(shifted)                                  # (TM, C)
    sumexp = jnp.sum(exp_s, axis=1, keepdims=True)            # (TM, 1)
    logsumexp = jnp.log(sumexp)                               # (TM, 1)

    # ---- cross entropy: logsumexp - shifted[b, y_b] (one-hot via iota compare) ----
    class_ids = jax.lax.broadcasted_iota(jnp.int32, (tm, c), 1)
    picked = jnp.sum(jnp.where(labels == class_ids, shifted, 0.0),
                     axis=1, keepdims=True)                   # (TM, 1)
    ce_rows = logsumexp - picked                              # (TM, 1)

    # ---- KL (log_target=True), algebraically folded:
    #   sum_c p*(logp - logcent) = recip(sumexp)*sum_c exp_s*(shifted - logcent) - logsumexp
    kl_inner = jnp.sum(exp_s * (shifted - logcent), axis=1, keepdims=True)
    kl_rows = kl_inner * pl.reciprocal(sumexp, approx=True) - logsumexp

    if has_pad:
        # rows beyond the real batch (only possible on the last tile) contribute 0
        row_ids = jax.lax.broadcasted_iota(jnp.int32, (tm, 1), 0) + i * tm
        valid = row_ids < batch
        ce_rows = jnp.where(valid, ce_rows, 0.0)
        kl_rows = jnp.where(valid, kl_rows, 0.0)

    ce_partial = jnp.sum(ce_rows)
    kl_partial = jnp.sum(kl_rows)

    # Lane-dense per-tile partials: sublane 0 = CE, sublane 1 = KL (rest zero).
    rid = jax.lax.broadcasted_iota(jnp.int32, (1, 8, 128), 1)
    out_ref[...] = jnp.where(rid == 0, ce_partial,
                             jnp.where(rid == 1, kl_partial, 0.0))


def ce_kl_pwce_loss(output, target, centroids, *, max_rows_per_tile=None):
    """JAX/Pallas equivalent of CE_KL_PWCE_loss.forward -> f32 vector (2,)."""
    B, C = output.shape
    assert centroids.shape == (B, C), centroids.shape
    assert target.shape == (B,), target.shape

    isz_l = output.dtype.itemsize
    isz_c = centroids.dtype.itemsize
    # dtype-aware sublane rounding: 8 rows for 32-bit, 16 for 16-bit, 32 for 8-bit
    sub = max(8, 32 // min(isz_l, isz_c, 4))

    # ---- VMEM-budget-derived batch tile ----
    phys_vmem = _physical_vmem_bytes()                        # 64 MiB (v7x) .. 128 MiB (v5e/v6e)
    vmem_limit = max(32 * 1024 * 1024,
                     min((phys_vmem * 3) // 4, 96 * 1024 * 1024))
    row_stream = 2 * C * (isz_l + isz_c)                      # logits+centroids, double-buffered
    row_labels = 2 * (8 * 128 * 4) // 8                       # (TM,1) i32 block, lane-padded, x2 bufs
    row_temps = 6 * C * 4                                     # in-kernel f32 (TM,C) intermediates
    budget = min((vmem_limit * 3) // 5, 40 * 1024 * 1024)     # headroom incl. v7x 64 MiB physical
    tm_cap = budget // (row_stream + row_labels + row_temps)
    tm_cap = max(sub, (tm_cap // sub) * sub)
    tm_cap = min(tm_cap, 8192)
    if max_rows_per_tile is not None:
        tm_cap = max(sub, min(tm_cap, _round_up(max_rows_per_tile, sub)))
    # TODO(synk): for vocab-scale C (full-row blocks overflow the budget even at
    # TM=sub, mandatory on v7x at f32 with C in the tens of thousands), add a
    # class-axis grid dim with an online (flash-style) logsumexp.

    if B <= tm_cap:
        num_tiles = 1
        tm = _round_up(B, sub)
    else:
        num_tiles = -(-B // tm_cap)
        tm = _round_up(-(-B // num_tiles), sub)                # even tiles, minimal padding
    b_pad = num_tiles * tm
    has_pad = b_pad != B

    if has_pad:
        pad = b_pad - B
        # padded rows: logits=0, centroids=1 (log=0), label=0 -> finite math,
        # masked out of the per-tile partial sums in the kernel.
        output = jnp.pad(output, ((0, pad), (0, 0)))
        centroids = jnp.pad(centroids, ((0, pad), (0, 0)), constant_values=1)
        target = jnp.pad(target, (0, pad))
    labels2d = target.reshape(b_pad, 1).astype(jnp.int32)

    kernel = functools.partial(_ce_kl_kernel, batch=B, has_pad=has_pad)

    partials = pl.pallas_call(
        kernel,
        out_shape=jax.ShapeDtypeStruct((num_tiles, 8, 128), jnp.float32),
        grid=(num_tiles,),
        in_specs=[
            pl.BlockSpec((tm, C), lambda i: (i, 0)),          # logits tile (native dtype)
            pl.BlockSpec((tm, C), lambda i: (i, 0)),          # centroids tile (native dtype)
            pl.BlockSpec((tm, 1), lambda i: (i, 0)),          # labels tile (int32)
        ],
        out_specs=pl.BlockSpec((1, 8, 128), lambda i: (i, 0, 0)),
        compiler_params=pltpu.CompilerParams(
            # Per-tile partial sums mean no cross-step state, so the batch axis
            # can be sharded across both v7x TensorCores; equivalent to
            # "arbitrary" on single-TC v5e/v6e.
            dimension_semantics=("parallel",),
            vmem_limit_bytes=int(vmem_limit),
        ),
    )(output, centroids, labels2d)

    inv_b = 1.0 / B
    ce = jnp.sum(partials[:, 0, 0]) * inv_b
    kl = jnp.sum(partials[:, 1, 0]) * inv_b
    return jnp.stack([ce, kl])


def _reference(output, target, centroids):
    logits = output.astype(jnp.float32)
    logp = jax.nn.log_softmax(logits, axis=1)
    B = logits.shape[0]
    ce = -jnp.mean(logp[jnp.arange(B), target])
    p = jnp.exp(logp)
    kl = jnp.sum(p * (logp - jnp.log(centroids.astype(jnp.float32)))) / B
    return jnp.stack([ce, kl])


if __name__ == "__main__":
    # Small shapes consistent with the module: n_classes=10, batch=20
    n_classes, batch = 10, 20
    key = jax.random.PRNGKey(0)
    k_out, k_tgt, k_cen = jax.random.split(key, 3)

    output = jax.random.normal(k_out, (batch, n_classes), jnp.float32)
    target = jax.random.randint(k_tgt, (batch,), 0, n_classes, jnp.int32)
    # centroids: per-sample probability distributions (the module takes .log())
    centroids = jax.nn.softmax(
        jax.random.normal(k_cen, (batch, n_classes), jnp.float32), axis=1)

    ref = _reference(output, target, centroids)

    # Default path: VMEM-budget tile covers the whole (padded) batch in one step.
    loss = jax.block_until_ready(ce_kl_pwce_loss(output, target, centroids))
    assert loss.shape == (2,)
    assert jnp.allclose(loss, ref, atol=1e-3, rtol=1e-3), (loss, ref)

    # Forced small tiles: exercises the multi-tile grid, padding mask and the
    # per-tile partial-sum ("parallel") reduction path (20 -> pad 24, grid of 3).
    loss_tiled = jax.block_until_ready(
        ce_kl_pwce_loss(output, target, centroids, max_rows_per_tile=8))
    assert jnp.allclose(loss_tiled, ref, atol=1e-3, rtol=1e-3), (loss_tiled, ref)

    print("KERNEL_OK")
</pallas_src>

<mosaic_0001>
module attributes {stable_mosaic.version = 11 : i64} {
  func.func @_ce_kl_kernel(%arg0: i32, %arg1: memref<24x10xf32, #tpu.memory_space<vmem>>, %arg2: memref<24x10xf32, #tpu.memory_space<vmem>>, %arg3: memref<24x1xi32, #tpu.memory_space<vmem>>, %arg4: memref<1x8x128xf32, #tpu.memory_space<vmem>>) attributes {dimension_semantics = [#tpu.dimension_semantics<parallel>], iteration_bounds = array<i64: 1>, scalar_prefetch = 0 : i64, scratch_operands = 0 : i64, tpu.core_type = #tpu.core_type<tc>, window_params = [{transform_indices = @transform_0, window_bounds = array<i64: 24, 10>}, {transform_indices = @transform_1, window_bounds = array<i64: 24, 10>}, {transform_indices = @transform_2, window_bounds = array<i64: 24, 1>}, {transform_indices = @transform_3, window_bounds = array<i64: 1, 8, 128>}]} {
    %c0 = arith.constant 0 : index
    %c0_0 = arith.constant 0 : index
    %0 = vector.load %arg1[%c0, %c0_0] : memref<24x10xf32, #tpu.memory_space<vmem>>, vector<24x10xf32>
    %c0_1 = arith.constant 0 : index
    %c0_2 = arith.constant 0 : index
    %1 = vector.load %arg2[%c0_1, %c0_2] : memref<24x10xf32, #tpu.memory_space<vmem>>, vector<24x10xf32>
    %2 = math.log %1 : vector<24x10xf32>
    %c0_3 = arith.constant 0 : index
    %c0_4 = arith.constant 0 : index
    %3 = vector.load %arg3[%c0_3, %c0_4] : memref<24x1xi32, #tpu.memory_space<vmem>>, vector<24x1xi32>
    %cst = arith.constant dense<0xFF800000> : vector<24xf32>
    %4 = vector.multi_reduction <maximumf>, %0, %cst [1] : vector<24x10xf32> to vector<24xf32>
    %5 = vector.shape_cast %4 : vector<24xf32> to vector<24x1xf32>
    %6 = vector.broadcast %5 : vector<24x1xf32> to vector<24x10xf32>
    %7 = arith.subf %0, %6 : vector<24x10xf32>
    %8 = math.exp %7 : vector<24x10xf32>
    %cst_5 = arith.constant dense<0.000000e+00> : vector<24xf32>
    %9 = vector.multi_reduction <add>, %8, %cst_5 [1] : vector<24x10xf32> to vector<24xf32>
    %10 = vector.shape_cast %9 : vector<24xf32> to vector<24x1xf32>
    %11 = math.log %10 : vector<24x1xf32>
    %12 = tpu.iota {dimensions = array<i32: 1>} : vector<24x10xi32>
    %13 = vector.broadcast %3 : vector<24x1xi32> to vector<24x10xi32>
    %14 = arith.cmpi eq, %13, %12 : vector<24x10xi32>
    %cst_6 = arith.constant 0.000000e+00 : f32
    %15 = vector.broadcast %cst_6 : f32 to vector<24x10xf32>
    %16 = arith.select %14, %7, %15 : vector<24x10xi1>, vector<24x10xf32>
    %cst_7 = arith.constant dense<0.000000e+00> : vector<24xf32>
    %17 = vector.multi_reduction <add>, %16, %cst_7 [1] : vector<24x10xf32> to vector<24xf32>
    %18 = vector.shape_cast %17 : vector<24xf32> to vector<24x1xf32>
    %19 = arith.subf %11, %18 : vector<24x1xf32>
    %20 = arith.subf %7, %2 : vector<24x10xf32>
    %21 = arith.mulf %8, %20 : vector<24x10xf32>
    %cst_8 = arith.constant dense<0.000000e+00> : vector<24xf32>
    %22 = vector.multi_reduction <add>, %21, %cst_8 [1] : vector<24x10xf32> to vector<24xf32>
    %23 = vector.shape_cast %22 : vector<24xf32> to vector<24x1xf32>
    %24 = tpu.reciprocal %10 {approx = true} : vector<24x1xf32> -> vector<24x1xf32>
    %25 = arith.mulf %23, %24 : vector<24x1xf32>
    %26 = arith.subf %25, %11 : vector<24x1xf32>
    %27 = tpu.iota {dimensions = array<i32: 0>} : vector<24x1xi32>
    %c24_i32 = arith.constant 24 : i32
    %28 = arith.muli %arg0, %c24_i32 : i32
    %29 = vector.broadcast %28 : i32 to vector<24x1xi32>
    %30 = arith.addi %27, %29 : vector<24x1xi32>
    %c20_i32 = arith.constant 20 : i32
    %31 = vector.broadcast %c20_i32 : i32 to vector<24x1xi32>
    %32 = arith.cmpi slt, %30, %31 : vector<24x1xi32>
    %cst_9 = arith.constant 0.000000e+00 : f32
    %33 = vector.broadcast %cst_9 : f32 to vector<24x1xf32>
    %34 = arith.select %32, %19, %33 : vector<24x1xi1>, vector<24x1xf32>
    %cst_10 = arith.constant 0.000000e+00 : f32
    %35 = vector.broadcast %cst_10 : f32 to vector<24x1xf32>
    %36 = arith.select %32, %26, %35 : vector<24x1xi1>, vector<24x1xf32>
    %37 = vector.shape_cast %34 : vector<24x1xf32> to vector<1x24x1xf32>
    %cst_11 = arith.constant dense<0.000000e+00> : vector<1xf32>
    %38 = vector.multi_reduction <add>, %37, %cst_11 [1, 2] : vector<1x24x1xf32> to vector<1xf32>
    %39 = vector.shape_cast %38 : vector<1xf32> to vector<1x1x1xf32>
    %40 = vector.extract %39[0, 0, 0] : f32 from vector<1x1x1xf32>
    %41 = vector.shape_cast %36 : vector<24x1xf32> to vector<1x24x1xf32>
    %cst_12 = arith.constant dense<0.000000e+00> : vector<1xf32>
    %42 = vector.multi_reduction <add>, %41, %cst_12 [1, 2] : vector<1x24x1xf32> to vector<1xf32>
    %43 = vector.shape_cast %42 : vector<1xf32> to vector<1x1x1xf32>
    %44 = vector.extract %43[0, 0, 0] : f32 from vector<1x1x1xf32>
    %45 = tpu.iota {dimensions = array<i32: 1>} : vector<1x8x128xi32>
    %c0_i32 = arith.constant 0 : i32
    %46 = vector.broadcast %c0_i32 : i32 to vector<1x8x128xi32>
    %47 = arith.cmpi eq, %45, %46 : vector<1x8x128xi32>
    %c1_i32 = arith.constant 1 : i32
    %48 = vector.broadcast %c1_i32 : i32 to vector<1x8x128xi32>
    %49 = arith.cmpi eq, %45, %48 : vector<1x8x128xi32>
    %cst_13 = arith.constant 0.000000e+00 : f32
    %50 = vector.broadcast %44 : f32 to vector<1x8x128xf32>
    %51 = vector.broadcast %cst_13 : f32 to vector<1x8x128xf32>
    %52 = arith.select %49, %50, %51 : vector<1x8x128xi1>, vector<1x8x128xf32>
    %53 = vector.broadcast %40 : f32 to vector<1x8x128xf32>
    %54 = arith.select %47, %53, %52 : vector<1x8x128xi1>, vector<1x8x128xf32>
    %c0_14 = arith.constant 0 : index
    %c0_15 = arith.constant 0 : index
    %c0_16 = arith.constant 0 : index
    %55 = vector.load %arg4[%c0_14, %c0_15, %c0_16] : memref<1x8x128xf32, #tpu.memory_space<vmem>>, vector<1x8x128xf32>
    tpu.vector_store %arg4[%c0_14, %c0_15, %c0_16], %54 {strides = array<i32>} : memref<1x8x128xf32, #tpu.memory_space<vmem>>, vector<1x8x128xf32>,
    return
  }
  func.func @transform_0(%arg0: i32) -> (i32, i32) {
    %c0_i32 = arith.constant 0 : i32
    %c0_i32_0 = arith.constant 0 : i32
    return %arg0, %c0_i32 : i32, i32
  }
  func.func @transform_1(%arg0: i32) -> (i32, i32) {
    %c0_i32 = arith.constant 0 : i32
    %c0_i32_0 = arith.constant 0 : i32
    return %arg0, %c0_i32 : i32, i32
  }
  func.func @transform_2(%arg0: i32) -> (i32, i32) {
    %c0_i32 = arith.constant 0 : i32
    %c0_i32_0 = arith.constant 0 : i32
    return %arg0, %c0_i32 : i32, i32
  }
  func.func @transform_3(%arg0: i32) -> (i32, i32, i32) {
    %c0_i32 = arith.constant 0 : i32
    %c0_i32_0 = arith.constant 0 : i32
    %c0_i32_1 = arith.constant 0 : i32
    return %arg0, %c0_i32, %c0_i32_0 : i32, i32, i32
  }
}

</mosaic_0001>

<bundles_post_ra>
// kernel: tpu_custom_call.1
= control target key start
LH: loop header
LB: loop body
LE: loop exit
PB: predicated region body
PF: predicated region fallthrough
CT: control target
= control target key end

     0   :  { %vm30_vm0 = vcmask 80896   ;;  %v246_v4 = vmov 0   ;;  %s316_s0 = inlined_call_operand.vmem [shape: f32[24,10], index: 0, kind: input, shape index: {}]   ;;  %s317_s1 = inlined_call_operand.vmem [shape: f32[24,10], index: 1, kind: input, shape index: {}]   ;;  %s318_s2 = inlined_call_operand.vmem [shape: s32[24,1], index: 2, kind: input, shape index: {}]   ;;  %s319_s3 = inlined_call_operand.hbm [shape: f32[1,8,128], index: 3, kind: output, shape index: {}]  }
   0x1   :  { %v17_v0 = vld [vmem:[%s316_s0 + $0x10] sm:$0xff]  ;;  %v15_v1 = vld [vmem:[%s316_s0] sm:$0xff]  ;;  %193 = vset.pattern.permute.xlu1 %v246_v4  ;;  %194 = vset.pattern.permute.xlu2 %v246_v4  ;;  %v28_v5 = vld [vmem:[%s318_s2 + $0x8] sm:$0xff] }
   0x2   :  { %v37_v2 = vsel %vm30_vm0, %v17_v0, -inf  ;;  %v31_v3 = vsel %vm30_vm0, %v15_v1, -inf }
   0x3   :  { %38 = vmax.xlane.f32.xlu1 %v37_v2  ;;  %32 = vmax.xlane.f32.xlu0 %v31_v3 }
   0x4   :  { %8 = vsyncpa [#allocation3], 0  ;;  %70 = vperm.xlu2 %194, %v28_v5   ;;  %195 = vset.pattern.permute.xlu0 %v246_v4  ;;  %v16_v6 = vld [vmem:[%s316_s0 + $0x8] sm:$0xff]  ;;  %v29_v8 = vld [vmem:[%s318_s2 + $0x10] sm:$0xff]  ;;  %v64_v26 = vlaneseq  ;;  %vm135_vm4 = vcmask 7168   ;;  %s178_s29 = sshll.u32 %s319_s3, 4  ;;  %s179_s29 = int_to_ptr.hbm [resolvable:$true] %s178_s29 }
   0x5   :  { %v34_v7 = vsel %vm30_vm0, %v16_v6, -inf  ;;  %v27_v9 = vld [vmem:[%s318_s2] sm:$0xff]  ;;  %v19_v12 = vld [vmem:[%s317_s1 + $0x8] sm:$0xff]  ;;  %v20_v37 = vld [vmem:[%s317_s1 + $0x10] sm:$0xff]  ;;  %s247_s4 = smov [#allocation2]  }
   0x6   :  { %196 = vlog2.f32 %v19_v12  ;;  %v18_v16 = vld [vmem:[%s317_s1] sm:$0xff]  ;;  %v65_v30 = vand.u32 127, %v64_v26  ;;  %v118_v4 = vshrl.u32 %v64_v26, 7  ;;  %s176_s5 = sshll.u32 %s247_s4, 4  ;;  %s177_s5 = int_to_ptr.vmem [resolvable:$true] %s176_s5 }
   0x8   :  { %vm165_vm6 = vcmp.eq.s32.totalorder %v118_v4, 1  ;;  %vm164_vm7 = vcmp.eq.s32.totalorder %v118_v4, 0 }
   0xb   :  { %35 = vmax.xlane.f32.xlu0 %v34_v7 }
   0xc   :  { %73 = vperm.xlu2 %194, %v29_v8   ;;  %v197_v19 = vpop.eup %196 }
   0xd   :  { %v24_v25 = vmul.f32 0.6931472, %v197_v19 }
  0x1c   :  { %67 = vperm.xlu1 %193, %v27_v9   ;;  %v120_v9 = vadd.s32 16, %v118_v4 }
  0x1e   :  { %vm128_vm5 = vcmp.lt.s32.totalorder %v120_v9, 20 }
  0x5e   :  { %v71_v20 = vpop.permute.xlu2 %70 }
  0x5f   :  { %vm76_vm3 = vcmp.eq.s32.totalorder %v71_v20, %v65_v30 }
  0x66   :  { %v74_v34 = vpop.permute.xlu2 %73 }
  0x67   :  { %vm77_vm1 = vcmp.eq.s32.totalorder %v74_v34, %v65_v30 }
  0x76   :  { %v33_v10 = vpop.xlane.xlu0 %32  ;;  %v39_v11 = vpop.xlane.xlu1 %38 }
  0x77   :  { %v40_v13 = vsub.f32 %v15_v1, %v33_v10  ;;  %v42_v15 = vsub.f32 %v17_v0, %v39_v11 }
  0x79   :  { %v43_v14 = vmul.f32 1.442695, %v40_v13  ;;  %v47_v17 = vmul.f32 1.442695, %v42_v15  ;;  %v80_v41 = vsel %vm77_vm1, %v42_v15, 0.0 }
  0x7a   :  { %v87_v44 = vsel %vm30_vm0, %v80_v41, 0.0 }
  0x7b   :  { %198 = vpow2.f32 %v43_v14 }
  0x7c   :  { %200 = vlog2.f32 %v18_v16 }
  0x7d   :  { %202 = vpow2.f32 %v47_v17 }
  0x7e   :  { %v36_v18 = vpop.xlane.xlu0 %35 }
  0x7f   :  { %v41_v21 = vsub.f32 %v16_v6, %v36_v18 }
  0x81   :  { %v199_v22 = vpop.eup %198  ;;  %v45_v23 = vmul.f32 1.442695, %v41_v21  ;;  %v94_v28 = vsub.f32 %v41_v21, %v24_v25  ;;  %v79_v52 = vsel %vm76_vm3, %v41_v21, 0.0 }
  0x82   :  { %v49_v24 = vsel %vm30_vm0, %v199_v22, 0.0  ;;  %v201_v27 = vpop.eup %200  ;;  %v84_v53 = vsel %vm30_vm0, %v79_v52, 0.0 }
  0x83   :  { %204 = vpow2.f32 %v45_v23  ;;  %50 = vadd.xlane.f32.xlu0 %v49_v24  ;;  %v203_v29 = vpop.eup %202  ;;  %v22_v32 = vmul.f32 0.6931472, %v201_v27 }
  0x84   :  { %v55_v31 = vsel %vm30_vm0, %v203_v29, 0.0  ;;  %206 = vlog2.f32 %v20_v37 }
  0x85   :  { %v93_v38 = vsub.f32 %v40_v13, %v22_v32 }
  0x87   :  { %v96_v40 = vmul.f32 %v199_v22, %v93_v38 }
  0x89   :  { %v205_v33 = vpop.eup %204  ;;  %v99_v43 = vsel %vm30_vm0, %v96_v40, 0.0 }
  0x8a   :  { %v52_v35 = vsel %vm30_vm0, %v205_v33, 0.0  ;;  %v97_v36 = vmul.f32 %v205_v33, %v94_v28  ;;  %v207_v45 = vpop.eup %206 }
  0x8b   :  { %56 = vadd.xlane.f32.xlu0 %v55_v31  ;;  %53 = vadd.xlane.f32.xlu2 %v52_v35  ;;  %v26_v46 = vmul.f32 0.6931472, %v207_v45 }
  0x8c   :  { %v102_v39 = vsel %vm30_vm0, %v97_v36, 0.0 }
  0x8d   :  { %103 = vadd.xlane.f32.xlu1 %v102_v39  ;;  %v95_v49 = vsub.f32 %v42_v15, %v26_v46 }
  0x8e   :  { %v68_v42 = vpop.permute.xlu1 %67 }
  0x8f   :  { %vm75_vm2 = vcmp.eq.s32.totalorder %v68_v42, %v65_v30  ;;  %v98_v50 = vmul.f32 %v203_v29, %v95_v49 }
  0x90   :  { %v78_v47 = vsel %vm75_vm2, %v40_v13, 0.0 }
  0x91   :  { %v81_v48 = vsel %vm30_vm0, %v78_v47, 0.0  ;;  %v105_v51 = vsel %vm30_vm0, %v98_v50, 0.0 }
  0x93   :  { %100 = vadd.xlane.f32.xlu0 %v99_v43  ;;  %88 = vadd.xlane.f32.xlu2 %v87_v44 }
  0x9b   :  { %82 = vadd.xlane.f32.xlu0 %v81_v48 }
  0xa3   :  { %106 = vadd.xlane.f32.xlu0 %v105_v51 }
  0xab   :  { %85 = vadd.xlane.f32.xlu0 %v84_v53 }
  0xf6   :  { %v51_v54 = vpop.xlane.xlu0 %50 }
  0xfe   :  { %v57_v55 = vpop.xlane.xlu0 %56  ;;  %v54_v56 = vpop.xlane.xlu2 %53 }
  0xff   :  { %208 = vlog2.f32 %v54_v56 }
 0x100   :  { %210 = vrcp.f32 %v54_v56  ;;  %v104_v60 = vpop.xlane.xlu1 %103 }
 0x101   :  { %212 = vlog2.f32 %v51_v54 }
 0x102   :  { %214 = vrcp.f32 %v51_v54 }
 0x103   :  { %216 = vlog2.f32 %v57_v55 }
 0x104   :  { %218 = vrcp.f32 %v57_v55 }
 0x105   :  { %v209_v58 = vpop.eup %208 }
 0x106   :  { %v101_v57 = vpop.xlane.xlu0 %100  ;;  %v211_v59 = vpop.eup %210  ;;  %v61_v0 = vmul.f32 0.6931472, %v209_v58 }
 0x107   :  { %v213_v61 = vpop.eup %212  ;;  %v112_v1 = vmul.f32 %v211_v59, %v104_v60  ;;  %v89_v15 = vpop.xlane.xlu2 %88 }
 0x108   :  { %v215_v63 = vpop.eup %214  ;;  %v59_v3 = vmul.f32 0.6931472, %v213_v61 }
 0x109   :  { %v111_v2 = vmul.f32 %v215_v63, %v101_v57  ;;  %v217_v5 = vpop.eup %216  ;;  %v115_v6 = vsub.f32 %v112_v1, %v61_v0 }
 0x10a   :  { %v219_v8 = vpop.eup %218  ;;  %v63_v11 = vmul.f32 0.6931472, %v217_v5 }
 0x10b   :  { %v114_v7 = vsub.f32 %v111_v2, %v59_v3  ;;  %v151_v14 = vsel %vm135_vm4, %v115_v6, 0.0 }
 0x10c   :  { %v92_v19 = vsub.f32 %v63_v11, %v89_v15 }
 0x10d   :  { %v150_v13 = vsel %vm135_vm4, %v114_v7, 0.0 }
 0x10e   :  { %v83_v62 = vpop.xlane.xlu0 %82  ;;  %v152_v18 = vadd.f32 %v151_v14, %v150_v13  ;;  %v131_v25 = vsel %vm128_vm5, %v92_v19, 0.0 }
 0x10f   :  { %v90_v21 = vsub.f32 %v59_v3, %v83_v62  ;;  %v139_v29 = vsel %vm135_vm4, %v131_v25, 0.0 }
 0x111   :  { %v136_v26 = vsel %vm135_vm4, %v90_v21, 0.0 }
 0x116   :  { %v107_v10 = vpop.xlane.xlu0 %106 }
 0x117   :  { %v113_v12 = vmul.f32 %v219_v8, %v107_v10 }
 0x119   :  { %v116_v16 = vsub.f32 %v113_v12, %v63_v11 }
 0x11b   :  { %v134_v17 = vsel %vm128_vm5, %v116_v16, 0.0 }
 0x11c   :  { %v153_v20 = vsel %vm135_vm4, %v134_v17, 0.0 }
 0x11d   :  { %v154_v22 = vadd.f32 %v153_v20, %v152_v18 }
 0x11e   :  { %v86_v23 = vpop.xlane.xlu0 %85 }
 0x11f   :  { %v91_v24 = vsub.f32 %v61_v0, %v86_v23  ;;  %155 = vadd.xlane.f32.xlu2 %v154_v22 }
 0x121   :  { %v137_v27 = vsel %vm135_vm4, %v91_v24, 0.0 }
 0x122   :  { %v138_v28 = vadd.f32 %v137_v27, %v136_v26 }
 0x124   :  { %v140_v30 = vadd.f32 %v139_v29, %v138_v28 }
 0x126   :  { %141 = vadd.xlane.f32.xlu0 %v140_v30 }
 0x192   :  { %v156_v31 = vpop.xlane.xlu2 %155 }
 0x193   :  { %v157_v32 = vrot.slane %v156_v31, 4 }
 0x195   :  { %v158_v33 = vadd.f32 %v157_v32, %v156_v31 }
 0x197   :  { %v159_v34 = vrot.slane %v158_v33, 2 }
 0x199   :  { %v142_v35 = vpop.xlane.xlu0 %141  ;;  %v160_v38 = vadd.f32 %v159_v34, %v158_v33 }
 0x19a   :  { %v143_v36 = vrot.slane %v142_v35, 4 }
 0x19b   :  { %v161_v41 = vrot.slane %v160_v38, 1 }
 0x19c   :  { %v144_v37 = vadd.f32 %v143_v36, %v142_v35 }
 0x19d   :  { %v162_v44 = vadd.f32 %v161_v41, %v160_v38 }
 0x19e   :  { %v145_v39 = vrot.slane %v144_v37, 2 }
 0x1a0   :  { %v146_v40 = vadd.f32 %v145_v39, %v144_v37 }
 0x1a2   :  { %v147_v42 = vrot.slane %v146_v40, 1 }
 0x1a4   :  { %v148_v43 = vadd.f32 %v147_v42, %v146_v40 }
 0x1a6   :  { %187 = vpush %v148_v43 }
 0x1a7   :  { %189 = vpush %v162_v44 }
 0x1d7   :  { %s188_s30 = spop %187 }
 0x1d8   :  { %v168_v45 = vstv %s188_s30  ;;  %s190_s6 = spop %189 }
 0x1d9   :  { %v166_v46 = vstv %s190_s6 }
 0x1da   :  { %v167_v47 = vsel %vm165_vm6, %v166_v46, 0.0 }
 0x1db   :  { %v169_v48 = vsel %vm164_vm7, %v168_v45, %v167_v47 }
 0x1dc   :  { %170 = vst [vmem:[#allocation2] sm:$0xff] %v169_v48 }
 0x1dd   :  { %181 = dma.vmem_to_hbm [thread:$0]  %s177_s5, 128, %s179_s29, [#allocation3]  }
 0x1de   :  { %244 = dma.done.wait [#allocation3], 128  }
 0x1df   :  { %245 = vsyncadd [#allocation3], 4294967168 }
 0x1e0   :  { %186 = vsyncpa [#allocation3], 1 }

</bundles_post_ra>
